<compile_context>
chip_gen: v6e
topology: v6e:2x2x1
jax: 0.10.0
libtpu: 0.0.40
codegen_flags: <defaults>
</compile_context>

<pallas_src>
import functools

import jax
import jax.numpy as jnp
from jax import lax
from jax.experimental import pallas as pl
from jax.experimental.pallas import tpu as pltpu


def _ls_ce_partial_kernel(x_ref, t_ref, out_ref, *, num_classes, num_rows,
                          ignore_index, row_tile, upcast, use_mxu_sums):
    """Per-tile partial sums: [smooth_sum, nll_sum, valid_count] in lanes 0..2 of sublane 0."""
    i = pl.program_id(0)

    x = x_ref[...]                                 # (tm, C), f32 or bf16
    if upcast:
        x = x.astype(jnp.float32)
    t = t_ref[...]                                 # (tm, 1) int32

    # numerically-stable shift; logp never materialized
    m = jnp.max(x, axis=-1, keepdims=True)         # (tm, 1)
    xm = x - m                                     # (tm, C)
    ex = jnp.exp(xm)                               # (tm, C)   EUP

    # one-hot gather on the shifted logits: logp[i, t_i] = (x[i, t_i] - m_i) - lse_i
    # Note: a target outside [0, C) that is not ignore_index silently picks 0 (i.e.
    # picked_logp = -lse), unlike PyTorch which would raise.
    col = lax.broadcasted_iota(jnp.int32, (1, num_classes), 1)               # (1, C)
    gathered = jnp.where(col == t, xm, jnp.zeros_like(xm))                   # (tm, C)

    if use_mxu_sums:
        # Offload the three class-axis reductions to the otherwise-idle MXU.
        # bf16 operands, exact f32 accumulation.
        ones_col = jnp.ones((num_classes, 1), dtype=x.dtype)                 # (C, 1)
        sum_ex = jnp.dot(ex, ones_col, preferred_element_type=jnp.float32)   # (tm, 1) f32
        sum_xm = jnp.dot(xm, ones_col, preferred_element_type=jnp.float32)   # (tm, 1) f32
        picked_xm = jnp.dot(gathered, ones_col,
                            preferred_element_type=jnp.float32)              # (tm, 1) f32
    else:
        sum_ex = jnp.sum(ex, axis=-1, keepdims=True)                         # (tm, 1) f32
        sum_xm = jnp.sum(xm, axis=-1, keepdims=True)                         # (tm, 1) f32
        picked_xm = jnp.sum(gathered, axis=-1, keepdims=True)                # (tm, 1) f32

    lse = jnp.log(sum_ex)                                                    # (tm, 1) f32
    # -sum_c log_preds[i, c] == C * lse - sum_c (x - m)   (all summands non-negative)
    smooth_row = jnp.float32(num_classes) * lse - sum_xm                     # (tm, 1)
    picked_logp = picked_xm - lse                                            # (tm, 1)

    # mask padded rows (global row index >= true N) out of everything
    row = lax.broadcasted_iota(jnp.int32, (row_tile, 1), 0) + i * row_tile
    in_range = row < num_rows
    valid = (t != ignore_index) & in_range

    s0 = jnp.sum(jnp.where(in_range, smooth_row, 0.0))      # smoothing sum (all real rows)
    s1 = jnp.sum(jnp.where(valid, -picked_logp, 0.0))       # NLL sum (valid rows)
    s2 = jnp.sum(valid.astype(jnp.float32))                 # valid-row count

    # write the three scalars into a lane-dense (1, 8, 128) output block
    lane = lax.broadcasted_iota(jnp.int32, (8, 128), 1)
    sub = lax.broadcasted_iota(jnp.int32, (8, 128), 0)
    vec = jnp.where((sub == 0) & (lane == 0), s0,
          jnp.where((sub == 0) & (lane == 1), s1,
          jnp.where((sub == 0) & (lane == 2), s2, 0.0)))
    out_ref[...] = vec[None]


def _vmem_capacity_bytes():
    """Physical VMEM per TensorCore; conservative (v7x = 64 MiB) fallback."""
    try:
        cap = int(getattr(pltpu.get_tpu_info(), "vmem_capacity_bytes", 0))
        if cap > 0:
            return cap
    except Exception:
        pass
    return 64 * 1024 * 1024


def _device_has_bf16_vpu():
    """v6e/v7x VPU+EUP are bf16-capable; v5e and older are not (keep the f32 upcast there)."""
    try:
        kind = jax.devices()[0].device_kind.lower()
    except Exception:
        return True
    return not any(s in kind for s in ("v2", "v3", "v4", "v5"))


def label_smoothing_cross_entropy(logits, targets, *, eps=0.1, ignore_index=-100,
                                  row_tile=None, compute_in_f32=None):
    """logits: (N, C) float (f32 or bf16), targets: (N,) int. Scalar f32 'mean' loss.

    Matches F.nll_loss(reduction='mean'): returns NaN if no target is != ignore_index.
    """
    n, c = logits.shape
    itemsize = jnp.dtype(logits.dtype).itemsize
    sub = 16 if itemsize == 2 else 8               # bf16 packs 16 sublanes per vreg

    if compute_in_f32 is None:
        compute_in_f32 = (itemsize != 2) or (not _device_has_bf16_vpu())
    upcast = bool(compute_in_f32) or itemsize != 2
    use_mxu_sums = not upcast                      # bf16 kept -> MXU dots with f32 accumulate

    vmem_cap = _vmem_capacity_bytes()
    if row_tile is None:
        # ~4 MiB logits blocks on 64 MiB-VMEM parts (v7x), ~8 MiB on 128 MiB parts (v5e/v6e):
        # near HBM roofline while double-buffered inputs + working copies stay in VMEM.
        target_block_bytes = (8 << 20) if vmem_cap >= (96 << 20) else (4 << 20)
        row_tile = max(sub, target_block_bytes // max(c * itemsize, 1))
    row_tile = -(-row_tile // sub) * sub           # round up to sublane granularity

    n_ceil = -(-n // sub) * sub
    # keep >= 2 grid steps so the "parallel" axis can shard over v7x's 2 TensorCores
    half_rows = -(-n_ceil // 2)
    half_rows = -(-half_rows // sub) * sub
    row_tile = min(row_tile, max(sub, half_rows))
    # never let one logits block exceed ~1/4 of physical VMEM (user row_tile / huge C guard)
    max_block_rows = ((vmem_cap // 4) // max(c * itemsize, 1)) // sub * sub
    row_tile = min(row_tile, max(sub, max_block_rows))

    n_pad = -(-n // row_tile) * row_tile
    num_tiles = n_pad // row_tile

    x = logits
    t = targets.astype(jnp.int32)
    if n_pad != n:
        x = jnp.pad(x, ((0, n_pad - n), (0, 0)))
        t = jnp.pad(t, (0, n_pad - n), constant_values=ignore_index)
    t2 = t.reshape(n_pad, 1)

    kernel = functools.partial(
        _ls_ce_partial_kernel, num_classes=int(c), num_rows=int(n),
        ignore_index=int(ignore_index), row_tile=int(row_tile),
        upcast=bool(upcast), use_mxu_sums=bool(use_mxu_sums))

    # double-buffered input blocks + in-kernel working set; clamp under physical VMEM
    in_block_bytes = row_tile * c * itemsize + row_tile * 4
    work_bytes = row_tile * c * 4                  # one f32-sized (tm, C) working copy
    vmem_limit = 2 * in_block_bytes + 6 * work_bytes + (16 << 20)
    vmem_limit = int(max(32 << 20, min(vmem_limit, vmem_cap - (8 << 20))))

    partials = pl.pallas_call(
        kernel,
        out_shape=jax.ShapeDtypeStruct((num_tiles, 8, 128), jnp.float32),
        grid_spec=pltpu.PrefetchScalarGridSpec(
            num_scalar_prefetch=0,
            grid=(num_tiles,),
            in_specs=[
                pl.BlockSpec((row_tile, c), lambda i: (i, 0)),
                pl.BlockSpec((row_tile, 1), lambda i: (i, 0)),
            ],
            out_specs=pl.BlockSpec((1, 8, 128), lambda i: (i, 0, 0)),
        ),
        compiler_params=pltpu.CompilerParams(
            dimension_semantics=("parallel",),
            vmem_limit_bytes=vmem_limit),
    )(x, t2)

    sums = jnp.sum(partials, axis=(0, 1))          # tree reduce over tiles -> (128,)
    smooth_sum, nll_sum, valid_count = sums[0], sums[1], sums[2]
    smooth = smooth_sum / jnp.float32(n)           # mean over ALL rows (true N)
    nll = nll_sum / valid_count                    # NaN if no valid rows (= F.nll_loss 'mean')
    return smooth * (eps / c) + (1.0 - eps) * nll


def _reference(logits, targets, eps=0.1, ignore_index=-100):
    logits = logits.astype(jnp.float32)
    logp = jax.nn.log_softmax(logits, axis=-1)
    c = logits.shape[-1]
    smooth = jnp.mean(-jnp.sum(logp, axis=-1))
    valid = targets != ignore_index
    safe_t = jnp.where(valid, targets, 0)
    picked = jnp.take_along_axis(logp, safe_t[:, None], axis=-1)[:, 0]
    nll = jnp.sum(jnp.where(valid, -picked, 0.0)) / jnp.sum(valid)
    return smooth * eps / c + (1.0 - eps) * nll


if __name__ == "__main__":
    key = jax.random.PRNGKey(0)

    # case 1: f32, N a multiple of the sublane granularity
    k1, k2 = jax.random.split(key)
    N, C = 16, 32                      # e.g. 16 tokens, 32 entity classes
    logits = jax.random.normal(k1, (N, C), dtype=jnp.float32) * 2.0
    targets = jax.random.randint(k2, (N,), 0, C, dtype=jnp.int32)
    targets = targets.at[3].set(-100).at[11].set(-100)     # ignored (padding) positions
    loss = jax.block_until_ready(label_smoothing_cross_entropy(logits, targets))
    ref = _reference(logits, targets)
    assert jnp.allclose(loss, ref, rtol=1e-5, atol=1e-5), (loss, ref)

    # case 2: ragged N (exercises in-kernel padding mask)
    k3, k4 = jax.random.split(k2)
    N2 = 21
    logits2 = jax.random.normal(k3, (N2, C), dtype=jnp.float32) * 2.0
    targets2 = jax.random.randint(k4, (N2,), 0, C, dtype=jnp.int32)
    targets2 = targets2.at[0].set(-100)
    loss2 = jax.block_until_ready(label_smoothing_cross_entropy(logits2, targets2))
    ref2 = _reference(logits2, targets2)
    assert jnp.allclose(loss2, ref2, rtol=1e-5, atol=1e-5), (loss2, ref2)

    # case 3: bf16 inputs (low-precision MXU-offload path on v6e/v7x, f32 upcast on v5e-)
    k5, k6 = jax.random.split(k4)
    N3 = 32
    logits3 = (jax.random.normal(k5, (N3, C), dtype=jnp.float32) * 2.0).astype(jnp.bfloat16)
    targets3 = jax.random.randint(k6, (N3,), 0, C, dtype=jnp.int32)
    targets3 = targets3.at[5].set(-100)
    loss3 = jax.block_until_ready(label_smoothing_cross_entropy(logits3, targets3))
    ref3 = _reference(logits3, targets3)
    assert jnp.allclose(loss3, ref3, rtol=5e-2, atol=5e-2), (loss3, ref3)

    print("KERNEL_OK")
</pallas_src>

<mosaic_0001>
module attributes {stable_mosaic.version = 11 : i64} {
  func.func @_ls_ce_partial_kernel(%arg0: i32, %arg1: memref<8x32xf32, #tpu.memory_space<vmem>>, %arg2: memref<8x1xi32, #tpu.memory_space<vmem>>, %arg3: memref<1x8x128xf32, #tpu.memory_space<vmem>>) attributes {dimension_semantics = [#tpu.dimension_semantics<parallel>], iteration_bounds = array<i64: 2>, scalar_prefetch = 0 : i64, scratch_operands = 0 : i64, tpu.core_type = #tpu.core_type<tc>, window_params = [{transform_indices = @transform_0, window_bounds = array<i64: 8, 32>}, {transform_indices = @transform_1, window_bounds = array<i64: 8, 1>}, {transform_indices = @transform_2, window_bounds = array<i64: 1, 8, 128>}]} {
    %c0 = arith.constant 0 : index
    %c0_0 = arith.constant 0 : index
    %0 = vector.load %arg1[%c0, %c0_0] : memref<8x32xf32, #tpu.memory_space<vmem>>, vector<8x32xf32>
    %c0_1 = arith.constant 0 : index
    %c0_2 = arith.constant 0 : index
    %1 = vector.load %arg2[%c0_1, %c0_2] : memref<8x1xi32, #tpu.memory_space<vmem>>, vector<8x1xi32>
    %cst = arith.constant dense<0xFF800000> : vector<8xf32>
    %2 = vector.multi_reduction <maximumf>, %0, %cst [1] : vector<8x32xf32> to vector<8xf32>
    %3 = vector.shape_cast %2 : vector<8xf32> to vector<8x1xf32>
    %4 = vector.broadcast %3 : vector<8x1xf32> to vector<8x32xf32>
    %5 = arith.subf %0, %4 : vector<8x32xf32>
    %6 = math.exp %5 : vector<8x32xf32>
    %7 = tpu.iota {dimensions = array<i32: 1>} : vector<1x32xi32>
    %8 = vector.broadcast %7 : vector<1x32xi32> to vector<8x32xi32>
    %9 = vector.broadcast %1 : vector<8x1xi32> to vector<8x32xi32>
    %10 = arith.cmpi eq, %8, %9 : vector<8x32xi32>
    %cst_3 = arith.constant 0.000000e+00 : f32
    %11 = vector.broadcast %cst_3 : f32 to vector<8x32xf32>
    %12 = arith.select %10, %5, %11 : vector<8x32xi1>, vector<8x32xf32>
    %cst_4 = arith.constant dense<0.000000e+00> : vector<8xf32>
    %13 = vector.multi_reduction <add>, %6, %cst_4 [1] : vector<8x32xf32> to vector<8xf32>
    %14 = vector.shape_cast %13 : vector<8xf32> to vector<8x1xf32>
    %cst_5 = arith.constant dense<0.000000e+00> : vector<8xf32>
    %15 = vector.multi_reduction <add>, %5, %cst_5 [1] : vector<8x32xf32> to vector<8xf32>
    %16 = vector.shape_cast %15 : vector<8xf32> to vector<8x1xf32>
    %cst_6 = arith.constant dense<0.000000e+00> : vector<8xf32>
    %17 = vector.multi_reduction <add>, %12, %cst_6 [1] : vector<8x32xf32> to vector<8xf32>
    %18 = vector.shape_cast %17 : vector<8xf32> to vector<8x1xf32>
    %19 = math.log %14 : vector<8x1xf32>
    %cst_7 = arith.constant 3.200000e+01 : f32
    %20 = vector.broadcast %cst_7 : f32 to vector<8x1xf32>
    %21 = arith.mulf %20, %19 : vector<8x1xf32>
    %22 = arith.subf %21, %16 : vector<8x1xf32>
    %23 = arith.subf %18, %19 : vector<8x1xf32>
    %24 = tpu.iota {dimensions = array<i32: 0>} : vector<8x1xi32>
    %c8_i32 = arith.constant 8 : i32
    %25 = arith.muli %arg0, %c8_i32 : i32
    %26 = vector.broadcast %25 : i32 to vector<8x1xi32>
    %27 = arith.addi %24, %26 : vector<8x1xi32>
    %c16_i32 = arith.constant 16 : i32
    %28 = vector.broadcast %c16_i32 : i32 to vector<8x1xi32>
    %29 = arith.cmpi slt, %27, %28 : vector<8x1xi32>
    %c-100_i32 = arith.constant -100 : i32
    %30 = vector.broadcast %c-100_i32 : i32 to vector<8x1xi32>
    %31 = arith.cmpi ne, %1, %30 : vector<8x1xi32>
    %32 = arith.andi %31, %29 : vector<8x1xi1>
    %cst_8 = arith.constant 0.000000e+00 : f32
    %33 = vector.broadcast %cst_8 : f32 to vector<8x1xf32>
    %34 = arith.select %29, %22, %33 : vector<8x1xi1>, vector<8x1xf32>
    %35 = vector.shape_cast %34 : vector<8x1xf32> to vector<1x8x1xf32>
    %cst_9 = arith.constant dense<0.000000e+00> : vector<1xf32>
    %36 = vector.multi_reduction <add>, %35, %cst_9 [1, 2] : vector<1x8x1xf32> to vector<1xf32>
    %37 = vector.shape_cast %36 : vector<1xf32> to vector<1x1x1xf32>
    %38 = vector.extract %37[0, 0, 0] : f32 from vector<1x1x1xf32>
    %cst_10 = arith.constant 0.000000e+00 : f32
    %39 = vector.broadcast %cst_10 : f32 to vector<8x1xf32>
    %40 = arith.subf %39, %23 : vector<8x1xf32>
    %cst_11 = arith.constant 0.000000e+00 : f32
    %41 = vector.broadcast %cst_11 : f32 to vector<8x1xf32>
    %42 = arith.select %32, %40, %41 : vector<8x1xi1>, vector<8x1xf32>
    %43 = vector.shape_cast %42 : vector<8x1xf32> to vector<1x8x1xf32>
    %cst_12 = arith.constant dense<0.000000e+00> : vector<1xf32>
    %44 = vector.multi_reduction <add>, %43, %cst_12 [1, 2] : vector<1x8x1xf32> to vector<1xf32>
    %45 = vector.shape_cast %44 : vector<1xf32> to vector<1x1x1xf32>
    %46 = vector.extract %45[0, 0, 0] : f32 from vector<1x1x1xf32>
    %47 = arith.extui %32 : vector<8x1xi1> to vector<8x1xi32>
    %48 = arith.sitofp %47 : vector<8x1xi32> to vector<8x1xf32>
    %49 = vector.shape_cast %48 : vector<8x1xf32> to vector<1x8x1xf32>
    %cst_13 = arith.constant dense<0.000000e+00> : vector<1xf32>
    %50 = vector.multi_reduction <add>, %49, %cst_13 [1, 2] : vector<1x8x1xf32> to vector<1xf32>
    %51 = vector.shape_cast %50 : vector<1xf32> to vector<1x1x1xf32>
    %52 = vector.extract %51[0, 0, 0] : f32 from vector<1x1x1xf32>
    %53 = tpu.iota {dimensions = array<i32: 1>} : vector<8x128xi32>
    %54 = tpu.iota {dimensions = array<i32: 0>} : vector<8x128xi32>
    %c0_i32 = arith.constant 0 : i32
    %55 = vector.broadcast %c0_i32 : i32 to vector<8x128xi32>
    %56 = arith.cmpi eq, %54, %55 : vector<8x128xi32>
    %c0_i32_14 = arith.constant 0 : i32
    %57 = vector.broadcast %c0_i32_14 : i32 to vector<8x128xi32>
    %58 = arith.cmpi eq, %53, %57 : vector<8x128xi32>
    %59 = arith.andi %56, %58 : vector<8x128xi1>
    %c0_i32_15 = arith.constant 0 : i32
    %60 = vector.broadcast %c0_i32_15 : i32 to vector<8x128xi32>
    %61 = arith.cmpi eq, %54, %60 : vector<8x128xi32>
    %c1_i32 = arith.constant 1 : i32
    %62 = vector.broadcast %c1_i32 : i32 to vector<8x128xi32>
    %63 = arith.cmpi eq, %53, %62 : vector<8x128xi32>
    %64 = arith.andi %61, %63 : vector<8x128xi1>
    %c0_i32_16 = arith.constant 0 : i32
    %65 = vector.broadcast %c0_i32_16 : i32 to vector<8x128xi32>
    %66 = arith.cmpi eq, %54, %65 : vector<8x128xi32>
    %c2_i32 = arith.constant 2 : i32
    %67 = vector.broadcast %c2_i32 : i32 to vector<8x128xi32>
    %68 = arith.cmpi eq, %53, %67 : vector<8x128xi32>
    %69 = arith.andi %66, %68 : vector<8x128xi1>
    %cst_17 = arith.constant 0.000000e+00 : f32
    %70 = vector.broadcast %52 : f32 to vector<8x128xf32>
    %71 = vector.broadcast %cst_17 : f32 to vector<8x128xf32>
    %72 = arith.select %69, %70, %71 : vector<8x128xi1>, vector<8x128xf32>
    %73 = vector.broadcast %46 : f32 to vector<8x128xf32>
    %74 = arith.select %64, %73, %72 : vector<8x128xi1>, vector<8x128xf32>
    %75 = vector.broadcast %38 : f32 to vector<8x128xf32>
    %76 = arith.select %59, %75, %74 : vector<8x128xi1>, vector<8x128xf32>
    %77 = vector.shape_cast %76 : vector<8x128xf32> to vector<1x8x128xf32>
    %c0_18 = arith.constant 0 : index
    %c0_19 = arith.constant 0 : index
    %c0_20 = arith.constant 0 : index
    %78 = vector.load %arg3[%c0_18, %c0_19, %c0_20] : memref<1x8x128xf32, #tpu.memory_space<vmem>>, vector<1x8x128xf32>
    tpu.vector_store %arg3[%c0_18, %c0_19, %c0_20], %77 {strides = array<i32>} : memref<1x8x128xf32, #tpu.memory_space<vmem>>, vector<1x8x128xf32>,
    return
  }
  func.func @transform_0(%arg0: i32) -> (i32, i32) {
    %c0_i32 = arith.constant 0 : i32
    %c0_i32_0 = arith.constant 0 : i32
    return %arg0, %c0_i32 : i32, i32
  }
  func.func @transform_1(%arg0: i32) -> (i32, i32) {
    %c0_i32 = arith.constant 0 : i32
    %c0_i32_0 = arith.constant 0 : i32
    return %arg0, %c0_i32 : i32, i32
  }
  func.func @transform_2(%arg0: i32) -> (i32, i32, i32) {
    %c0_i32 = arith.constant 0 : i32
    %c0_i32_0 = arith.constant 0 : i32
    %c0_i32_1 = arith.constant 0 : i32
    return %arg0, %c0_i32, %c0_i32_0 : i32, i32, i32
  }
}

</mosaic_0001>

<bundles_post_ra>
// kernel: tpu_custom_call.1
= control target key start
LH: loop header
LB: loop body
LE: loop exit
PB: predicated region body
PF: predicated region fallthrough
CT: control target
= control target key end

     0   :  { %7 = vsyncpa [#allocation3], 0  ;;  %s585_s0 = inlined_call_operand.vmem [shape: f32[16,32], index: 0, kind: input, shape index: {}]   ;;  %s586_s1 = inlined_call_operand.vmem [shape: s32[16,1], index: 1, kind: input, shape index: {}]   ;;  %s587_s2 = inlined_call_operand.hbm [shape: f32[2,8,128], index: 2, kind: output, shape index: {}]  }
   0x1   :  { %9 = vsyncpa [#allocation3 + $0x1], 0  ;;  %s474_s9 = smov 0   ;;  %s476_s10 = smov 0  }
   0x2   :  { %s478_s11 = smov 0   ;;  %s480_s12 = smov 0  }
   0x3 LB: > { %s495_s13 = sadd.s32 4294967295, %s454_s12   ;;  %s329_s14 = sadd.s32 4294967294, %s454_s12   ;;  %s454_s12 = sphi %s480_s12, %s593_s12   ;;  %s450_s11 = sphi %s478_s11, %s592_s11   ;;  %s446_s10 = sphi %s476_s10, %s591_s10   ;;  %s442_s9 = sphi %s474_s9, %s590_s9  }
   0x4   : > { %s499_s15 = sadd.s32 1, %s454_s12   ;;  %s74_s16 = sadd.s32 1, %s450_s11 }
   0x5   : > { %s71_s17 = ssub.s32 %s454_s12, %s499_s15  ;;  %p84_p0 = scmp.ne.s32.totalorder %s450_s11, %s446_s10 }
   0x6   : > { %p72_p1 = scmp.eq.s32.totalorder %s71_s17, 0  ;;  %p85_p2 = scmp.eq.s32.totalorder %s495_s13, 1 }
   0x7   : > { %p90_p3 = scmp.ne.s32.totalorder %s446_s10, %s442_s9  ;;  %p91_p4 = scmp.eq.s32.totalorder %s329_s14, 1 }
   0x8   : > { %s510_s18 = scalar_select %p72_p1, %s450_s11, %s74_s16  }
   0x9   : > { %p512_p5 = por %p85_p2, %p84_p0  ;;  %p516_p6 = por %p91_p4, %p90_p3 }
   0xa   : > { %p332_p7 = scmp.ge.s32.totalorder %s454_s12, 1  ;;  %p123_p8 = scmp.lt.s32.totalorder %s454_s12, 3 }
   0xc   : > { %p124_p9 = pnand %p332_p7, %p123_p8 }
   0xd   : > { %p148_p10 = scmp.lt.s32.totalorder (!%p124_p9), %s495_s13, 1  ;;  %s336_s29 = sshll.u32 (!%p124_p9), %s495_s13, 3 }
   0xe   : > { %127 = sbr.rel (%p124_p9) target bundleno = 567 (0x237), region = 28  ;;  %s145_s30 = sand.u32 (!%p124_p9), 1, %s446_s10  }
   0xf   : > { %s333_s3 = sshll.u32 (!%p124_p9), %s145_s30, 3  ;;  %s339_s6 = sshll.u32 (!%p124_p9), %s495_s13, 7 }
  0x10   : > { %s147_s8 = scalar_lea.vmem (!%p124_p9), [#allocation2], %s333_s3  ;;  %s458_s23 = smov (!%p124_p9), [#allocation2]  }
  0x11   : > { %s258_s14 = sshll.u32 (!%p124_p9), %s147_s8, 4  ;;  %s398_s24 = sshll.u32 (!%p124_p9), %s458_s23, 4  ;;  %s259_s14 = int_to_ptr.vmem [resolvable:$true] %s258_s14  ;;  %s399_s24 = int_to_ptr.vmem [resolvable:$false] %s398_s24 }
  0x12   : > { %p401_p0 = scmp.lt.s32.totalorder (!%p124_p9), %s259_s14, %s399_s24 }
  0x13   : > { %v456_v0 = vmov 0   ;;  %s149_s21 = scalar_select %p148_p10, %s495_s13, 1  ;;  %vm158_vm0 = vcmask 261120   ;;  %v165_v7 = vlaneseq  ;;  %v189_v17 = vstv %s336_s29 }
  0x14   : > { %389 = vset.pattern.permute.xlu0 %v456_v0  ;;  %vm195_vm4 = vcmask 7168   ;;  %v457_v30 = vmov 0.0   ;;  %s245_s13 = scalar_lea.sflag [#allocation3], %s145_s30 }
  0x15   : > { %s334_s22 = sshll.u32 %s149_s21, 3  ;;  %v531_v8 = vand.u32 127, %v165_v7  ;;  %v538_v16 = vshrl.u32 %v165_v7, 7  ;;  %s550_s21 = scalar_lea.hbm %s587_s2, %s339_s6 }
  0x16   : > { %s151_s25 = scalar_lea.vmem %s585_s0, %s334_s22  ;;  %s155_s28 = scalar_lea.vmem %s586_s1, %s334_s22 }
  0x17   : > { %v156_v1 = vld [vmem:[%s151_s25] sm:$0xff]  ;;  %v190_v19 = vadd.s32 %v189_v17, %v538_v16  ;;  %vm230_vm6 = vcmp.eq.s32.totalorder %v538_v16, 0  ;;  %vm235_vm7 = vcmp.eq.s32.totalorder %v531_v8, 2  ;;  %vm233_vm8 = vcmp.eq.s32.totalorder %v531_v8, 1  ;;  %s394_s22 = scalar_lea.vmem %s259_s14, 128  ;;  %s400_s25 = scalar_lea.vmem %s399_s24, 256 }
  0x18   : > { %v159_v2 = vsel %vm158_vm0, %v156_v1, -inf  ;;  %v157_v3 = vld [vmem:[%s155_s28] sm:$0xff]  ;;  %vm231_vm9 = vcmp.eq.s32.totalorder %v531_v8, 0  ;;  %vm236_vm10 = vmand %vm230_vm6, %vm235_vm7  ;;  %p395_p11 = scmp.ne.s32.totalorder %s259_s14, %s394_s22  ;;  %p402_p1 = scmp.lt.s32.totalorder %s400_s25, %s394_s22 }
  0x19   : > { %160 = vmax.xlane.f32.xlu0 %v159_v2  ;;  %vm192_vm2 = vcmp.ne.s32.totalorder %v157_v3, 4294967196  ;;  %vm191_vm3 = vcmp.lt.s32.totalorder %v190_v19, 16  ;;  %vm234_vm11 = vmand %vm230_vm6, %vm233_vm8 }
  0x1a   : > { %vm193_vm5 = vmand %vm192_vm2, %vm191_vm3  ;;  %p396_p12 = pnand %p395_p11, %p512_p5  ;;  %p403_p2 = por %p402_p1, %p401_p0 }
  0x1b   : > { %v337_v31 = vsel %vm193_vm5, 1.0, %v457_v30  ;;  %vm232_vm12 = vmand %vm230_vm6, %vm231_vm9 }
  0x1c   : > { %v220_v33 = vsel %vm195_vm4, %v337_v31, 0.0  ;;  %p397_p13 = pneg %p396_p12 }
  0x1e   : > { %p404_p3 = pnand %p403_p2, %p397_p13 }
  0x2f   : > { %168 = vperm.xlu0 %389, %v157_v3  }
  0xa2   : > { %v161_v4 = vpop.xlane.xlu0 %160 }
  0xa3   : > { %v162_v5 = vsub.f32 %v156_v1, %v161_v4 }
  0xa5   : > { %v163_v6 = vmul.f32 1.442695, %v162_v5  ;;  %v175_v14 = vsel %vm158_vm0, %v162_v5, 0.0 }
  0xa7   : > { %390 = vpow2.f32 %v163_v6 }
  0xaa   : > { %v169_v9 = vpop.permute.xlu0 %168 }
  0xab   : > { %vm170_vm1 = vcmp.eq.s32.totalorder %v531_v8, %v169_v9 }
  0xac   : > { %v171_v12 = vsel %vm170_vm1, %v162_v5, 0.0 }
  0xad   : > { %v178_v13 = vsel %vm158_vm0, %v171_v12, 0.0 }
  0xb4   : > { %v391_v10 = vpop.eup %390 }
  0xb5   : > { %v172_v11 = vsel %vm158_vm0, %v391_v10, 0.0 }
  0xb6   : > { %173 = vadd.xlane.f32.xlu1 %v172_v11 }
  0xba   : > { %179 = vadd.xlane.f32.xlu1 %v178_v13 }
  0xbe   : > { %176 = vadd.xlane.f32.xlu1 %v175_v14 }
 0x13f   : > { %v174_v15 = vpop.xlane.xlu1 %173 }
 0x140   : > { %392 = vlog2.f32 %v174_v15 }
 0x143   : > { %v180_v18 = vpop.xlane.xlu1 %179 }
 0x147   : > { %v177_v24 = vpop.xlane.xlu1 %176 }
 0x14d   : > { %v393_v20 = vpop.eup %392 }
 0x14e   : > { %v182_v21 = vmul.f32 0.6931472, %v393_v20 }
 0x150   : > { %v185_v22 = vsub.f32 %v180_v18, %v182_v21  ;;  %v183_v23 = vmul.f32 32.0, %v182_v21 }
 0x152   : > { %v206_v25 = vsub.f32 0.0, %v185_v22  ;;  %v184_v26 = vsub.f32 %v183_v23, %v177_v24 }
 0x154   : > { %v194_v27 = vsel %vm191_vm3, %v184_v26, 0.0  ;;  %v207_v29 = vsel %vm193_vm5, %v206_v25, 0.0 }
 0x155   : > { %v196_v28 = vsel %vm195_vm4, %v194_v27, 0.0  ;;  %v208_v32 = vsel %vm195_vm4, %v207_v29, 0.0 }
 0x156   : > { %197 = vadd.xlane.f32.xlu1 %v196_v28 }
 0x15a   : > { %209 = vadd.xlane.f32.xlu1 %v208_v32 }
 0x15e   : > { %221 = vadd.xlane.f32.xlu1 %v220_v33 }
 0x1df   : > { %v198_v34 = vpop.xlane.xlu1 %197 }
 0x1e0   : > { %v199_v35 = vrot.slane %v198_v34, 4 }
 0x1e2   : > { %v200_v36 = vadd.f32 %v199_v35, %v198_v34 }
 0x1e3   : > { %v210_v37 = vpop.xlane.xlu1 %209 }
 0x1e4   : > { %v201_v38 = vrot.slane %v200_v36, 2  ;;  %v211_v39 = vrot.slane %v210_v37, 4 }
 0x1e6   : > { %v212_v40 = vadd.f32 %v211_v39, %v210_v37  ;;  %v202_v41 = vadd.f32 %v201_v38, %v200_v36 }
 0x1e7   : > { %v222_v42 = vpop.xlane.xlu1 %221 }
 0x1e8   : > { %v213_v43 = vrot.slane %v212_v40, 2  ;;  %v223_v44 = vrot.slane %v222_v42, 4  ;;  %v203_v45 = vrot.slane %v202_v41, 1 }
 0x1ea   : > { %v224_v46 = vadd.f32 %v223_v44, %v222_v42  ;;  %v204_v47 = vadd.f32 %v203_v45, %v202_v41  ;;  %v214_v48 = vadd.f32 %v213_v43, %v212_v40 }
 0x1ec   : > { %v225_v49 = vrot.slane %v224_v46, 2  ;;  %342 = vpush %v204_v47  ;;  %v215_v50 = vrot.slane %v214_v48, 1 }
 0x1ee   : > { %v226_v51 = vadd.f32 %v225_v49, %v224_v46  ;;  %v216_v52 = vadd.f32 %v215_v50, %v214_v48 }
 0x1f0   : > { %344 = vpush %v216_v52  ;;  %v227_v53 = vrot.slane %v226_v51, 1 }
 0x1f2   : > { %v228_v54 = vadd.f32 %v227_v53, %v226_v51 }
 0x1f4   : > { %346 = vpush %v228_v54 }
 0x21d   : > { %s343_s4 = spop %342 }
 0x21e   : > { %v241_v58 = vstv %s343_s4 }
 0x221   : > { %s345_s5 = spop %344 }
 0x222   : > { %v239_v56 = vstv %s345_s5 }
 0x225   : > { %s347_s7 = spop %346 }
 0x226   : > { %v237_v55 = vstv %s347_s7 }
 0x227   : > { %v238_v57 = vsel %vm236_vm10, %v237_v55, 0.0 }
 0x228   : > { %v240_v59 = vsel %vm234_vm11, %v239_v56, %v238_v57 }
 0x229   : > { %v242_v60 = vsel %vm232_vm12, %v241_v58, %v240_v59 }
 0x22a   : > { %243 = vst [vmem:[%s147_s8] sm:$0xff] %v242_v60 }
 0x22b   : > { %407 = shalt.err (!%p404_p3)
}
 0x22c   : > { %s408_s26 = scalar_lea.hbm %s550_s21, 128  ;;  %s412_s29 = scalar_lea.hbm %s587_s2, 256 }
 0x22d   : > { %p409_p4 = scmp.ne.s32.totalorder %s550_s21, %s408_s26  ;;  %p413_p9 = scmp.lt.s32.totalorder %s550_s21, %s587_s2 }
 0x22e   : > { %p414_p10 = scmp.lt.s32.totalorder %s412_s29, %s408_s26 }
 0x22f   : > { %p410_p7 = pnand %p409_p4, %p512_p5 }
 0x230   : > { %p415_p11 = por %p414_p10, %p413_p9 }
 0x231   : > { %p411_p8 = pneg %p410_p7 }
 0x233   : > { %p416_p12 = pnand %p415_p11, %p411_p8 }
 0x235   : > { %419 = shalt.err (!%p416_p12)
}
 0x236   : > { %348 = dma.vmem_to_hbm [thread:$0]  (%p512_p5), %s259_s14, 128, %s550_s21, %s245_s13  }
 0x237 PF: > { %p354_p13 = scmp.ge.s32.totalorder %s454_s12, 2  ;;  %s270_s4 = sand.u32 1, %s442_s9  }
 0x238   : > { %s271_s5 = scalar_lea.sflag [#allocation3], %s270_s4 }
 0x239   : > { %p351_p0 = pnand %p354_p13, %p516_p6 }
 0x23b   : > { %p352_p1 = pneg %p351_p0 }
 0x23d   : > { %437 = dma.done.wait (%p352_p1), %s271_s5, 128  }
 0x23e   : > { %439 = vsyncadd (%p352_p1), %s271_s5, 4294967168  ;;  %p12_p2 = scmp.ge.s32.totalorder %s499_s15, 4   ;;  %s590_s9 = smov %s446_s10 }
 0x23f   : > { %s591_s10 = smov %s450_s11  ;;  %s592_s11 = smov %s510_s18 }
 0x240   : > { %s593_s12 = smov %s499_s15  ;;  %14 = sbr.rel (!%p12_p2) target bundleno = 3 (0x3), region = 66 }
 0x245   :  { %276 = vsyncpa [#allocation3], 1 }
 0x246   :  { %278 = vsyncpa [#allocation3 + $0x1], 1 }

</bundles_post_ra>
